<compile_context>
chip_gen: v7x
topology: tpu7x:2x2x1
jax: 0.10.0
libtpu: 0.0.40
codegen_flags: <defaults>
</compile_context>

<pallas_src>
import functools

import jax
import jax.numpy as jnp
from jax.experimental import pallas as pl
from jax.experimental.pallas import tpu as pltpu


def _round_up(x, m):
    return ((x + m - 1) // m) * m


def _pad2(a, rows, cols):
    return jnp.pad(a, ((0, rows - a.shape[0]), (0, cols - a.shape[1])))


def _num_tensorcores():
    """2 TensorCores per chip on v4/v5p/v7x-class parts; 1 on v5e/v6e."""
    try:
        kind = jax.devices()[0].device_kind.lower()
    except Exception:
        return 1
    if "lite" in kind or "v5e" in kind or "v6e" in kind or "v6" in kind:
        return 1
    if "v4" in kind or "v5p" in kind or "v7" in kind:
        return 2
    return 1


def pointnet_kernel(x_ref, w1_ref, b1_ref, w2_ref, b2_ref, w3_ref, b3_ref,
                    o_ref, *, n_points, n_padded, tm, tblk):
    s = pl.program_id(0)                  # parallel split (2nd TensorCore on v7x)
    j = pl.program_id(1)                  # tile index within split (reduction axis)

    @pl.when(j == 0)
    def _init():
        # Running-max accumulator lives in the VMEM-resident output block.
        o_ref[...] = jnp.full(o_ref.shape, -jnp.inf, o_ref.dtype)

    # MLP: all matmuls accumulate in f32 on the MXU; biases stay f32.
    x = x_ref[...]                                            # (tm, din_p)  K is tiny
    h1 = jnp.dot(x, w1_ref[...], preferred_element_type=jnp.float32) + b1_ref[...]
    h1 = jnp.maximum(h1, 0.0)
    h2 = jnp.dot(h1.astype(w2_ref.dtype), w2_ref[...],
                 preferred_element_type=jnp.float32) + b2_ref[...]
    h2 = jnp.maximum(h2, 0.0)
    h3 = jnp.dot(h2.astype(w3_ref.dtype), w3_ref[...],
                 preferred_element_type=jnp.float32) + b3_ref[...]

    dout_p = h3.shape[1]

    def _accumulate(vals):
        # (tm, dout_p) -> (tm//8, 8, dout_p): leading-dim split is layout
        # preserving; the axis-0 max is vreg-to-vreg VPU maxima (no XLU).
        tile_max = jnp.max(vals.reshape(tm // 8, 8, dout_p), axis=0)
        o_ref[...] = jnp.maximum(o_ref[...], tile_max)

    if n_points == n_padded:
        # No padded rows anywhere: plain max on every tile (static decision).
        _accumulate(h3)
    else:
        row0 = (s * tblk + j) * tm
        needs_mask = row0 + tm > n_points   # tile contains padded rows

        @pl.when(needs_mask)
        def _tail():
            rows = row0 + jax.lax.broadcasted_iota(jnp.int32, h3.shape, 0)
            _accumulate(jnp.where(rows < n_points, h3, -jnp.inf))

        @pl.when(jnp.logical_not(needs_mask))
        def _body():
            _accumulate(h3)


def pointnet_forward(x, params, *, tm_max=4096, num_splits=None,
                     compute_dtype=jnp.bfloat16):
    (w1, b1), (w2, b2), (w3, b3) = params
    n, din = x.shape
    hidden = w1.shape[1]
    dout = w3.shape[1]

    LANE = 128
    # Only sublane-pad the tiny input feature dim in HBM (x is the dominant
    # stream); pad hidden/output feature dims to full lanes so the matmuls and
    # the output store stay lane-dense.
    din_p = _round_up(din, 8)
    hid_p = _round_up(hidden, LANE)
    dout_p = _round_up(dout, LANE)

    itemsize = jnp.dtype(compute_dtype).itemsize
    sub = max(8, 32 // itemsize)          # native sublane multiple for the dtype

    if num_splits is None:
        num_splits = _num_tensorcores()
    num_splits = max(1, int(num_splits))

    # --- VMEM accounting -----------------------------------------------------
    # Double-buffered streamed x, f32 intermediates (proxy), double-buffered
    # resident weights/biases, double-buffered output accumulator.
    weight_bytes = 2 * itemsize * (din_p * hid_p + hid_p * hid_p + hid_p * dout_p)
    bias_bytes = 2 * 4 * (2 * hid_p + dout_p)
    out_bytes = 2 * 8 * dout_p * 4
    fixed_bytes = weight_bytes + bias_bytes + out_bytes
    bytes_per_row = 2 * din_p * itemsize + 4 * (2 * hid_p + dout_p)

    stream_budget = 24 * 1024 * 1024      # conservative even for v7x (64 MiB phys)
    avail = max(stream_budget - fixed_bytes, 1 << 20)
    tm_budget = max(sub, avail // bytes_per_row)

    rows_per_split = pl.cdiv(n, num_splits)
    tm = int(min(tm_max, tm_budget, _round_up(rows_per_split, sub)))
    tm = max(sub, _round_up(tm, sub))
    tblk = int(pl.cdiv(rows_per_split, tm))
    n_pad = num_splits * tblk * tm

    vmem_need = fixed_bytes + tm * bytes_per_row
    vmem_limit = int(min(56 * 1024 * 1024,
                         max(32 * 1024 * 1024, vmem_need + (8 << 20))))

    # --- Host-side padding (weights tiny; x padded once, only to 8 columns) ---
    xp = _pad2(x, n_pad, din_p).astype(compute_dtype)
    w1p = _pad2(w1, din_p, hid_p).astype(compute_dtype)
    w2p = _pad2(w2, hid_p, hid_p).astype(compute_dtype)
    w3p = _pad2(w3, hid_p, dout_p).astype(compute_dtype)
    b1p = _pad2(b1, 1, hid_p).astype(jnp.float32)   # biases stay f32
    b2p = _pad2(b2, 1, hid_p).astype(jnp.float32)
    b3p = _pad2(b3, 1, dout_p).astype(jnp.float32)

    kernel = functools.partial(pointnet_kernel, n_points=n, n_padded=n_pad,
                               tm=tm, tblk=tblk)

    flops = 2 * n_pad * (din_p * hid_p + hid_p * hid_p + hid_p * dout_p)
    bytes_accessed = int(
        sum(a.size * a.dtype.itemsize
            for a in (xp, w1p, b1p, w2p, b2p, w3p, b3p))
        + num_splits * 8 * dout_p * 4)

    out = pl.pallas_call(
        kernel,
        out_shape=jax.ShapeDtypeStruct((num_splits * 8, dout_p), jnp.float32),
        grid=(num_splits, tblk),
        in_specs=[
            pl.BlockSpec((tm, din_p), lambda s, j: (s * tblk + j, 0)),   # streamed x
            pl.BlockSpec((din_p, hid_p), lambda s, j: (0, 0)),           # w1 (resident)
            pl.BlockSpec((1, hid_p), lambda s, j: (0, 0)),               # b1
            pl.BlockSpec((hid_p, hid_p), lambda s, j: (0, 0)),           # w2
            pl.BlockSpec((1, hid_p), lambda s, j: (0, 0)),               # b2
            pl.BlockSpec((hid_p, dout_p), lambda s, j: (0, 0)),          # w3
            pl.BlockSpec((1, dout_p), lambda s, j: (0, 0)),              # b3
        ],
        out_specs=pl.BlockSpec((8, dout_p), lambda s, j: (s, 0)),        # accumulator
        compiler_params=pltpu.CompilerParams(
            dimension_semantics=("parallel", "arbitrary"),
            vmem_limit_bytes=vmem_limit),
        cost_estimate=pl.CostEstimate(
            flops=flops, transcendentals=0, bytes_accessed=bytes_accessed),
    )(xp, w1p, b1p, w2p, b2p, w3p, b3p)

    # Combine per-split partial maxes (8 accumulator sublanes each) and strip
    # lane padding -> (output_dim,). Matches torch.max(x, dim=0)[0].squeeze(0).
    return jnp.max(out, axis=0)[:dout]


def init_params(key, input_dim, hidden_dim, output_dim):
    """Deterministic PyTorch-Linear-style init: U(-1/sqrt(fan_in), 1/sqrt(fan_in))."""
    def linear(key, fan_in, fan_out):
        kw, kb = jax.random.split(key)
        bound = 1.0 / jnp.sqrt(fan_in)
        # Stored as (in, out) so the kernel computes x @ W (== x @ W_torch.T).
        w = jax.random.uniform(kw, (fan_in, fan_out), jnp.float32, -bound, bound)
        b = jax.random.uniform(kb, (1, fan_out), jnp.float32, -bound, bound)
        return w, b

    k1, k2, k3 = jax.random.split(key, 3)
    return (
        linear(k1, input_dim, hidden_dim),
        linear(k2, hidden_dim, hidden_dim),
        linear(k3, hidden_dim, output_dim),
    )


def reference_forward(x, params):
    (w1, b1), (w2, b2), (w3, b3) = params
    h = jax.nn.relu(x @ w1 + b1)
    h = jax.nn.relu(h @ w2 + b2)
    h = h @ w3 + b3
    return jnp.max(h, axis=0)


if __name__ == "__main__":
    # Small shapes consistent with the module (xyz point cloud).
    N, INPUT_DIM, HIDDEN_DIM, OUTPUT_DIM = 50, 3, 32, 8

    key = jax.random.PRNGKey(0)
    kx, kp = jax.random.split(key)
    x = jax.random.normal(kx, (N, INPUT_DIM), dtype=jnp.float32)
    params = init_params(kp, INPUT_DIM, HIDDEN_DIM, OUTPUT_DIM)

    ref = reference_forward(x, params)

    # f32 path with a tiny point-tile so the grid exercises multi-step
    # accumulation on the "arbitrary" axis and the gated tail-row masking.
    out_f32 = jax.block_until_ready(
        pointnet_forward(x, params, tm_max=8, compute_dtype=jnp.float32))
    assert out_f32.shape == (OUTPUT_DIM,), out_f32.shape
    assert jnp.allclose(out_f32, ref, atol=1e-5, rtol=1e-5), (out_f32, ref)

    # Default path: bf16-streamed x/weights (input quantization), f32 MXU
    # accumulation, generation-dependent num_splits, large point tile.
    out_bf16 = jax.block_until_ready(pointnet_forward(x, params))
    assert out_bf16.shape == (OUTPUT_DIM,), out_bf16.shape
    assert jnp.allclose(out_bf16, ref, atol=1e-1, rtol=1e-1), (out_bf16, ref)

    print("KERNEL_OK")
</pallas_src>

<mosaic_0001>
module attributes {stable_mosaic.version = 11 : i64} {
  func.func @pointnet_kernel(%arg0: i32, %arg1: i32, %arg2: memref<8x8xf32, #tpu.memory_space<vmem>>, %arg3: memref<8x128xf32, #tpu.memory_space<vmem>>, %arg4: memref<1x128xf32, #tpu.memory_space<vmem>>, %arg5: memref<128x128xf32, #tpu.memory_space<vmem>>, %arg6: memref<1x128xf32, #tpu.memory_space<vmem>>, %arg7: memref<128x128xf32, #tpu.memory_space<vmem>>, %arg8: memref<1x128xf32, #tpu.memory_space<vmem>>, %arg9: memref<8x128xf32, #tpu.memory_space<vmem>>) attributes {dimension_semantics = [#tpu.dimension_semantics<parallel>, #tpu.dimension_semantics<arbitrary>], iteration_bounds = array<i64: 1, 7>, scalar_prefetch = 0 : i64, scratch_operands = 0 : i64, tpu.core_type = #tpu.core_type<tc>, window_params = [{transform_indices = @transform_0, window_bounds = array<i64: 8, 8>}, {pipeline_mode = #tpu.pipeline_mode<synchronous>, transform_indices = @transform_1, window_bounds = array<i64: 8, 128>}, {pipeline_mode = #tpu.pipeline_mode<synchronous>, transform_indices = @transform_2, window_bounds = array<i64: 1, 128>}, {pipeline_mode = #tpu.pipeline_mode<synchronous>, transform_indices = @transform_3, window_bounds = array<i64: 128, 128>}, {pipeline_mode = #tpu.pipeline_mode<synchronous>, transform_indices = @transform_4, window_bounds = array<i64: 1, 128>}, {pipeline_mode = #tpu.pipeline_mode<synchronous>, transform_indices = @transform_5, window_bounds = array<i64: 128, 128>}, {pipeline_mode = #tpu.pipeline_mode<synchronous>, transform_indices = @transform_6, window_bounds = array<i64: 1, 128>}, {transform_indices = @transform_7, window_bounds = array<i64: 8, 128>}]} {
    %c0_i32 = arith.constant 0 : i32
    %0 = arith.cmpi eq, %arg1, %c0_i32 : i32
    %1 = arith.extui %0 : i1 to i32
    %c0_i32_0 = arith.constant 0 : i32
    %2 = arith.cmpi ne, %1, %c0_i32_0 : i32
    scf.if %2 {
      %cst_21 = arith.constant 0xFF800000 : f32
      %33 = vector.broadcast %cst_21 : f32 to vector<8x128xf32>
      %c0_22 = arith.constant 0 : index
      %c0_23 = arith.constant 0 : index
      %34 = vector.load %arg9[%c0_22, %c0_23] : memref<8x128xf32, #tpu.memory_space<vmem>>, vector<8x128xf32>
      tpu.vector_store %arg9[%c0_22, %c0_23], %33 {strides = array<i32>} : memref<8x128xf32, #tpu.memory_space<vmem>>, vector<8x128xf32>,
    } else {
    }
    %c0 = arith.constant 0 : index
    %c0_1 = arith.constant 0 : index
    %3 = vector.load %arg2[%c0, %c0_1] : memref<8x8xf32, #tpu.memory_space<vmem>>, vector<8x8xf32>
    %c0_2 = arith.constant 0 : index
    %c0_3 = arith.constant 0 : index
    %4 = vector.load %arg3[%c0_2, %c0_3] : memref<8x128xf32, #tpu.memory_space<vmem>>, vector<8x128xf32>
    %cst = arith.constant dense<0.000000e+00> : vector<8x128xf32>
    %5 = tpu.matmul %3, %4, %cst {dimension_numbers = #tpu.dot_dimension_numbers<[1], [0], [0], [1], [0, 0, 1, 1], [], []>} : vector<8x8xf32>, vector<8x128xf32>, vector<8x128xf32> -> vector<8x128xf32>
    %c0_4 = arith.constant 0 : index
    %c0_5 = arith.constant 0 : index
    %6 = vector.load %arg4[%c0_4, %c0_5] : memref<1x128xf32, #tpu.memory_space<vmem>>, vector<1x128xf32>
    %7 = vector.broadcast %6 : vector<1x128xf32> to vector<8x128xf32>
    %8 = arith.addf %5, %7 : vector<8x128xf32>
    %cst_6 = arith.constant 0.000000e+00 : f32
    %9 = vector.broadcast %cst_6 : f32 to vector<8x128xf32>
    %10 = arith.maximumf %8, %9 : vector<8x128xf32>
    %c0_7 = arith.constant 0 : index
    %c0_8 = arith.constant 0 : index
    %11 = vector.load %arg5[%c0_7, %c0_8] : memref<128x128xf32, #tpu.memory_space<vmem>>, vector<128x128xf32>
    %cst_9 = arith.constant dense<0.000000e+00> : vector<8x128xf32>
    %12 = tpu.matmul %10, %11, %cst_9 {dimension_numbers = #tpu.dot_dimension_numbers<[1], [0], [0], [1], [0, 0, 1, 1], [], []>} : vector<8x128xf32>, vector<128x128xf32>, vector<8x128xf32> -> vector<8x128xf32>
    %c0_10 = arith.constant 0 : index
    %c0_11 = arith.constant 0 : index
    %13 = vector.load %arg6[%c0_10, %c0_11] : memref<1x128xf32, #tpu.memory_space<vmem>>, vector<1x128xf32>
    %14 = vector.broadcast %13 : vector<1x128xf32> to vector<8x128xf32>
    %15 = arith.addf %12, %14 : vector<8x128xf32>
    %cst_12 = arith.constant 0.000000e+00 : f32
    %16 = vector.broadcast %cst_12 : f32 to vector<8x128xf32>
    %17 = arith.maximumf %15, %16 : vector<8x128xf32>
    %c0_13 = arith.constant 0 : index
    %c0_14 = arith.constant 0 : index
    %18 = vector.load %arg7[%c0_13, %c0_14] : memref<128x128xf32, #tpu.memory_space<vmem>>, vector<128x128xf32>
    %cst_15 = arith.constant dense<0.000000e+00> : vector<8x128xf32>
    %19 = tpu.matmul %17, %18, %cst_15 {dimension_numbers = #tpu.dot_dimension_numbers<[1], [0], [0], [1], [0, 0, 1, 1], [], []>} : vector<8x128xf32>, vector<128x128xf32>, vector<8x128xf32> -> vector<8x128xf32>
    %c0_16 = arith.constant 0 : index
    %c0_17 = arith.constant 0 : index
    %20 = vector.load %arg8[%c0_16, %c0_17] : memref<1x128xf32, #tpu.memory_space<vmem>>, vector<1x128xf32>
    %21 = vector.broadcast %20 : vector<1x128xf32> to vector<8x128xf32>
    %22 = arith.addf %19, %21 : vector<8x128xf32>
    %c7_i32 = arith.constant 7 : i32
    %23 = arith.muli %arg0, %c7_i32 : i32
    %24 = arith.addi %23, %arg1 : i32
    %c8_i32 = arith.constant 8 : i32
    %25 = arith.muli %24, %c8_i32 : i32
    %c8_i32_18 = arith.constant 8 : i32
    %26 = arith.addi %25, %c8_i32_18 : i32
    %c50_i32 = arith.constant 50 : i32
    %27 = arith.cmpi sgt, %26, %c50_i32 : i32
    %28 = arith.extui %27 : i1 to i32
    %c0_i32_19 = arith.constant 0 : i32
    %29 = arith.cmpi ne, %28, %c0_i32_19 : i32
    scf.if %29 {
      %33 = tpu.iota {dimensions = array<i32: 0>} : vector<8x128xi32>
      %34 = vector.broadcast %25 : i32 to vector<8x128xi32>
      %35 = arith.addi %34, %33 : vector<8x128xi32>
      %c50_i32_21 = arith.constant 50 : i32
      %36 = vector.broadcast %c50_i32_21 : i32 to vector<8x128xi32>
      %37 = arith.cmpi slt, %35, %36 : vector<8x128xi32>
      %cst_22 = arith.constant 0xFF800000 : f32
      %38 = vector.broadcast %cst_22 : f32 to vector<8x128xf32>
      %39 = arith.select %37, %22, %38 : vector<8x128xi1>, vector<8x128xf32>
      %40 = vector.shape_cast %39 : vector<8x128xf32> to vector<1x8x128xf32>
      %cst_23 = arith.constant dense<0xFF800000> : vector<8x128xf32>
      %41 = vector.multi_reduction <maximumf>, %40, %cst_23 [0] : vector<1x8x128xf32> to vector<8x128xf32>
      %c0_24 = arith.constant 0 : index
      %c0_25 = arith.constant 0 : index
      %42 = vector.load %arg9[%c0_24, %c0_25] : memref<8x128xf32, #tpu.memory_space<vmem>>, vector<8x128xf32>
      %43 = arith.maximumf %42, %41 : vector<8x128xf32>
      %c0_26 = arith.constant 0 : index
      %c0_27 = arith.constant 0 : index
      %44 = vector.load %arg9[%c0_26, %c0_27] : memref<8x128xf32, #tpu.memory_space<vmem>>, vector<8x128xf32>
      tpu.vector_store %arg9[%c0_26, %c0_27], %43 {strides = array<i32>} : memref<8x128xf32, #tpu.memory_space<vmem>>, vector<8x128xf32>,
    } else {
    }
    %true = arith.constant true
    %30 = arith.xori %27, %true : i1
    %31 = arith.extui %30 : i1 to i32
    %c0_i32_20 = arith.constant 0 : i32
    %32 = arith.cmpi ne, %31, %c0_i32_20 : i32
    scf.if %32 {
      %33 = vector.shape_cast %22 : vector<8x128xf32> to vector<1x8x128xf32>
      %cst_21 = arith.constant dense<0xFF800000> : vector<8x128xf32>
      %34 = vector.multi_reduction <maximumf>, %33, %cst_21 [0] : vector<1x8x128xf32> to vector<8x128xf32>
      %c0_22 = arith.constant 0 : index
      %c0_23 = arith.constant 0 : index
      %35 = vector.load %arg9[%c0_22, %c0_23] : memref<8x128xf32, #tpu.memory_space<vmem>>, vector<8x128xf32>
      %36 = arith.maximumf %35, %34 : vector<8x128xf32>
      %c0_24 = arith.constant 0 : index
      %c0_25 = arith.constant 0 : index
      %37 = vector.load %arg9[%c0_24, %c0_25] : memref<8x128xf32, #tpu.memory_space<vmem>>, vector<8x128xf32>
      tpu.vector_store %arg9[%c0_24, %c0_25], %36 {strides = array<i32>} : memref<8x128xf32, #tpu.memory_space<vmem>>, vector<8x128xf32>,
    } else {
    }
    return
  }
  func.func @transform_0(%arg0: i32, %arg1: i32) -> (i32, i32) {
    %c7_i32 = arith.constant 7 : i32
    %0 = arith.muli %arg0, %c7_i32 : i32
    %1 = arith.addi %0, %arg1 : i32
    %c0_i32 = arith.constant 0 : i32
    %c0_i32_0 = arith.constant 0 : i32
    return %1, %c0_i32 : i32, i32
  }
  func.func @transform_1(%arg0: i32, %arg1: i32) -> (i32, i32) {
    %c0_i32 = arith.constant 0 : i32
    %c0_i32_0 = arith.constant 0 : i32
    %c0_i32_1 = arith.constant 0 : i32
    return %c0_i32, %c0_i32_0 : i32, i32
  }
  func.func @transform_2(%arg0: i32, %arg1: i32) -> (i32, i32) {
    %c0_i32 = arith.constant 0 : i32
    %c0_i32_0 = arith.constant 0 : i32
    %c0_i32_1 = arith.constant 0 : i32
    return %c0_i32, %c0_i32_0 : i32, i32
  }
  func.func @transform_3(%arg0: i32, %arg1: i32) -> (i32, i32) {
    %c0_i32 = arith.constant 0 : i32
    %c0_i32_0 = arith.constant 0 : i32
    %c0_i32_1 = arith.constant 0 : i32
    return %c0_i32, %c0_i32_0 : i32, i32
  }
  func.func @transform_4(%arg0: i32, %arg1: i32) -> (i32, i32) {
    %c0_i32 = arith.constant 0 : i32
    %c0_i32_0 = arith.constant 0 : i32
    %c0_i32_1 = arith.constant 0 : i32
    return %c0_i32, %c0_i32_0 : i32, i32
  }
  func.func @transform_5(%arg0: i32, %arg1: i32) -> (i32, i32) {
    %c0_i32 = arith.constant 0 : i32
    %c0_i32_0 = arith.constant 0 : i32
    %c0_i32_1 = arith.constant 0 : i32
    return %c0_i32, %c0_i32_0 : i32, i32
  }
  func.func @transform_6(%arg0: i32, %arg1: i32) -> (i32, i32) {
    %c0_i32 = arith.constant 0 : i32
    %c0_i32_0 = arith.constant 0 : i32
    %c0_i32_1 = arith.constant 0 : i32
    return %c0_i32, %c0_i32_0 : i32, i32
  }
  func.func @transform_7(%arg0: i32, %arg1: i32) -> (i32, i32) {
    %c0_i32 = arith.constant 0 : i32
    %c0_i32_0 = arith.constant 0 : i32
    return %arg0, %c0_i32 : i32, i32
  }
}

</mosaic_0001>

<bundles_post_ra>
// kernel: tpu_custom_call.1
= control target key start
LH: loop header
LB: loop body
LE: loop exit
PB: predicated region body
PF: predicated region fallthrough
CT: control target
= control target key end

     0   :  { %12 = vsyncpa [#allocation3], 0  ;;  %s1282_s0 = inlined_call_operand.vmem [shape: f32[56,8], index: 0, kind: input, shape index: {}]   ;;  %s1283_s1 = inlined_call_operand.vmem [shape: f32[8,128], index: 1, kind: input, shape index: {}]   ;;  %s1284_s2 = inlined_call_operand.vmem [shape: f32[1,128], index: 2, kind: input, shape index: {}]   ;;  %s1285_s3 = inlined_call_operand.hbm [shape: f32[128,128], index: 3, kind: input, shape index: {}]   ;;  %s1286_s4 = inlined_call_operand.vmem [shape: f32[1,128], index: 4, kind: input, shape index: {}]   ;;  %s1287_s5 = inlined_call_operand.hbm [shape: f32[128,128], index: 5, kind: input, shape index: {}]   ;;  %s1288_s6 = inlined_call_operand.vmem [shape: f32[1,128], index: 6, kind: input, shape index: {}]   ;;  %s1289_s7 = inlined_call_operand.hbm [shape: f32[8,128], index: 7, kind: output, shape index: {}]  }
   0x1   :  { %13 = vsyncpa [#allocation6], 0 }
   0x2   :  { %14 = vsyncpa [#allocation4], 0  ;;  %s1109_s24 = smov 0   ;;  %s1111_s25 = smov 0  }
   0x3   :  { %s1113_s26 = smov 0  }
   0x4 LB: > { %s704_s27 = sadd.s32 4294967295, %s1058_s26   ;;  %s29_s28 = sadd.s32 1, %s1054_s25  ;;  %s1058_s26 = sphi %s1113_s26, %s20_s26   ;;  %s1054_s25 = sphi %s1111_s25, %s1300_s25   ;;  %s1050_s24 = sphi %s1109_s24, %s1299_s24  }
   0x5   : > { %p30_p0 = scmp.ge.s32.totalorder %s29_s28, 7  ;;  %p705_p1 = scmp.ge.s32.totalorder %s1058_s26, 1 }
   0x6   : > { %p219_p2 = scmp.lt.s32.totalorder %s1058_s26, 8  ;;  %p1136_p4 = scmp.eq.s32.totalorder %s704_s27, 0 }
   0x7   : > { %s1302_s28 = smov (%p30_p0, %s29_s28), 0  ;;  %s1060_s8 = smov [#allocation2]  }
   0x8   : > { %p1130_p3 = pnand %p705_p1, %p219_p2  ;;  %s237_s9 = sshll.u32 %s1060_s8, 4  ;;  %s238_s9 = int_to_ptr.vmem [resolvable:$true] %s237_s9 }
   0x9   : > { %s1294_s30 = scalar_select %p1136_p4, 1, 0 }
   0xa   : > { %s1293_s29 = scalar_select %p1130_p3, 1, 0 }
   0xb   : > { %p896_p5 = pneg %p1130_p3  ;;  %s1061_s11 = smov [#allocation5]  }
   0xc   : > { %s253_s12 = sshll.u32 %s1061_s11, 4  ;;  %s942_s15 = scalar_lea.hbm %s1285_s3, 2048  ;;  %s1148_s12 = int_to_ptr.vmem [resolvable:$true] %s253_s12 }
   0xd   : > { %p1144_p6 = pnand %p1136_p4, %p896_p5  ;;  %p943_p7 = scmp.ne.s32.totalorder %s1285_s3, %s942_s15 }
   0xe   : > { %p949_p11 = scmp.lt.u32.totalorder %s942_s15, %s1285_s3 }
   0xf   : > { %p944_p8 = pneg %p1144_p6 }
  0x11   : > { %p945_p9 = pnand %p944_p8, %p943_p7 }
  0x13   : > { %p946_p10 = pneg %p945_p9 }
  0x15   : > { %p951_p12 = pnand %p949_p11, %p946_p10 }
  0x17   : > { %954 = shalt.err (!%p951_p12)
}
  0x18   : > { %s955_s20 = scalar_lea.vmem %s238_s9, 2048  ;;  %p963_p2 = scmp.lt.s32.totalorder %s238_s9, %s238_s9 }
  0x19   : > { %p956_p13 = scmp.ne.s32.totalorder %s238_s9, %s955_s20  ;;  %p964_p5 = scmp.lt.s32.totalorder %s955_s20, %s955_s20 }
  0x1b   : > { %p958_p0 = pnand %p956_p13, %p944_p8  ;;  %p965_p4 = por %p964_p5, %p963_p2 }
  0x1d   : > { %p959_p1 = pneg %p958_p0 }
  0x1f   : > { %p966_p3 = pnand %p965_p4, %p959_p1 }
  0x21   : > { %969 = shalt.err (!%p966_p3)
}
  0x22   : > { %s1062_s21 = smov 128   ;;  %s1063_s22 = smov 8  }
  0x23   : > { %899 = dma.hbm_to_vmem [thread:$0]  (!%p1144_p6), %s1285_s3, 2048, %s238_s9, [#allocation3], %s1062_s21, %s1062_s21, %s1063_s22  }
  0x24   : > { %s970_s14 = scalar_lea.hbm %s1287_s5, 2048 }
  0x25   : > { %p971_p7 = scmp.ne.s32.totalorder %s1287_s5, %s970_s14  ;;  %p977_p9 = scmp.lt.u32.totalorder %s970_s14, %s1287_s5 }
  0x27   : > { %p973_p3 = pnand %p971_p7, %p944_p8 }
  0x29   : > { %p974_p4 = pneg %p973_p3 }
  0x2b   : > { %p979_p10 = pnand %p977_p9, %p974_p4 }
  0x2d   : > { %982 = shalt.err (!%p979_p10)
}
  0x2e   : > { %s983_s9 = scalar_lea.vmem %s1148_s12, 2048  ;;  %p991_p0 = scmp.lt.s32.totalorder %s1148_s12, %s1148_s12 }
  0x2f   : > { %p984_p11 = scmp.ne.s32.totalorder %s1148_s12, %s983_s9  ;;  %p992_p1 = scmp.lt.s32.totalorder %s983_s9, %s983_s9 }
  0x31   : > { %p986_p12 = pnand %p984_p11, %p944_p8  ;;  %p993_p2 = por %p992_p1, %p991_p0 }
  0x33   : > { %p987_p13 = pneg %p986_p12 }
  0x35   : > { %p994_p5 = pnand %p993_p2, %p987_p13 }
  0x37   : > { %997 = shalt.err (!%p994_p5)
}
  0x38   : > { %902 = dma.hbm_to_vmem [thread:$0]  (!%p1144_p6), %s1287_s5, 2048, %s1148_s12, [#allocation6], %s1062_s21, %s1062_s21, %s1063_s22  }
  0x39   : > { %p1296_p7 = scmp.ne.s32.totalorder %s1293_s29, 0 }
  0x3a   : > { %p1297_p3 = scmp.ne.s32.totalorder (!%p1296_p7), %s1294_s30, 0 }
  0x3b   : > { %283 = sbr.rel (%p1296_p7) target bundleno = 767 (0x2ff), region = 48 }
  0x42   : > { %1037 = dma.done.wait (%p1297_p3), [#allocation3], 2048  }
  0x43   : > { %1039 = vsyncadd (%p1297_p3), [#allocation3], 4294965248 }
  0x44   : > { %1041 = dma.done.wait (%p1297_p3), [#allocation6], 2048  }
  0x45   : > { %1043 = vsyncadd (%p1297_p3), [#allocation6], 4294965248  ;;  %p317_p8 = scmp.lt.s32.totalorder %s1050_s24, 6  ;;  %p713_p6 = scmp.ne.s32.totalorder %s1050_s24, 0 }
  0x46   : > { %v1064_v0 = vmov (!%p713_p6), -inf  }
  0x47   : > { %s318_s10 = scalar_select %p317_p8, %s1050_s24, 6 }
  0x48   : > { %326 = sbr.rel (%p713_p6) target bundleno = 79 (0x4f), region = 60  ;;  %327 = vst [vmem:[#allocation7] sm:$0xff] (!%p713_p6), %v1064_v0 }
  0x49   : > { %s712_s12 = sshll.u32 %s318_s10, 3 }
  0x4a   : > { %s320_s22 = scalar_lea.vmem %s1282_s0, %s712_s12 }
  0x4f PF: > { %v329_v1 = vld [vmem:[%s1283_s1] sm:$0xff]  ;;  %vm337_vm0 = vcmask 64512   ;;  %v1065_v3 = vmov 0.0   ;;  %vm1066_vm1 = vmmov 0   ;;  %v413_v5 = vld [vmem:[#allocation2 + $0x8] sm:$0xff]  ;;  %v414_v6 = vld [vmem:[#allocation2 + $0x10] sm:$0xff] }
  0x50   : > { %v328_v2 = vld [vmem:[%s320_s22] sm:$0xff]  ;;  %761 = vmatprep.subr.mxu0 %v1065_v3  ;;  %763 = vmatprep.mubr.msk.f32.mxu0 %vm1066_vm1, %v1065_v3  ;;  %v1067_v7 = vmov 0.0|0.0   ;;  %v415_v9 = vld [vmem:[#allocation2 + $0x18] sm:$0xff]  ;;  %v417_v12 = vld [vmem:[#allocation2 + $0x28] sm:$0xff]  ;;  %s718_s15 = sshll.u32 %s1050_s24, 3 }
  0x51   : > { %v412_v4 = vld [vmem:[#allocation2] sm:$0xff]  ;;  %762 = vmatpush3.msra.mxu0 %v329_v1  ;;  %836 = vmatprep.subr.bf16.mxu1 %v1067_v7  ;;  %v840_v10 = vpack.c.bf16 %v415_v9, %v414_v6  ;;  %v418_v14 = vld [vmem:[#allocation2 + $0x30] sm:$0xff]  ;;  %v419_v15 = vld [vmem:[#allocation2 + $0x38] sm:$0xff]  ;;  %s602_s16 = sadd.s32 8, %s718_s15 }
  0x52   : > { %v837_v8 = vpack.c.bf16 %v413_v5, %v412_v4  ;;  %764 = vmatmul.mubr.msk.f32.vlgmr.msra.gmra.mrb[0].mxu0 %vm337_vm0, %v328_v2  ;;  %798 = vmatprep.mubr.msk.f32.mxu1 %vm1066_vm1, %v1065_v3  ;;  %v416_v11 = vld [vmem:[#allocation2 + $0x20] sm:$0xff]  ;;  %v846_v16 = vpack.c.bf16 %v419_v15, %v418_v14  ;;  %v421_v18 = vld [vmem:[#allocation2 + $0x48] sm:$0xff]  ;;  %v422_v20 = vld [vmem:[#allocation2 + $0x50] sm:$0xff]  ;;  %p719_p4 = scmp.le.s32.totalorder %s602_s16, 50 }
  0x53   : > { %860 = vmatprep.subr.bf16.mxu0 %v1067_v7  ;;  %833 = vmatprep.mubr.msk.f32.mxu0 %vm1066_vm1, %v1065_v3  ;;  %v843_v13 = vpack.c.bf16 %v417_v12, %v416_v11  ;;  %v420_v17 = vld [vmem:[#allocation2 + $0x40] sm:$0xff]  ;;  %v423_v21 = vld [vmem:[#allocation2 + $0x58] sm:$0xff]  ;;  %v425_v24 = vld [vmem:[#allocation2 + $0x68] sm:$0xff]  ;;  %v607_v3 = vlaneseq (!%p719_p4)  ;;  %v609_v4 = vstv (!%p719_p4), %s718_s15 }
  0x54   : > { %838 = vmatpush3.bf16.msra.mxu1 %v837_v8  ;;  %v849_v19 = vpack.c.bf16 %v421_v18, %v420_v17  ;;  %v852_v22 = vpack.c.bf16 %v423_v21, %v422_v20  ;;  %v424_v23 = vld [vmem:[#allocation2 + $0x60] sm:$0xff]  ;;  %v426_v26 = vld [vmem:[#allocation2 + $0x70] sm:$0xff]  ;;  %v427_v27 = vld [vmem:[#allocation2 + $0x78] sm:$0xff] }
  0x55   : > { %839 = vmatprep.subr.bf16.mxu1 %v1067_v7  ;;  %v855_v25 = vpack.c.bf16 %v425_v24, %v424_v23  ;;  %v858_v28 = vpack.c.bf16 %v427_v27, %v426_v26  ;;  %v506_v29 = vld [vmem:[#allocation5] sm:$0xff]  ;;  %v507_v30 = vld [vmem:[#allocation5 + $0x8] sm:$0xff]  ;;  %v508_v31 = vld [vmem:[#allocation5 + $0x10] sm:$0xff]  ;;  %v608_v5 = vshrl.u32 (!%p719_p4), %v607_v3, 7 }
  0x56   : > { %v861_v32 = vpack.c.bf16 %v507_v30, %v506_v29  ;;  %v509_v33 = vld [vmem:[#allocation5 + $0x18] sm:$0xff]  ;;  %v510_v35 = vld [vmem:[#allocation5 + $0x20] sm:$0xff]  ;;  %v511_v36 = vld [vmem:[#allocation5 + $0x28] sm:$0xff] }
  0x57   : > { %v864_v34 = vpack.c.bf16 %v509_v33, %v508_v31  ;;  %v867_v37 = vpack.c.bf16 %v511_v36, %v510_v35  ;;  %v512_v38 = vld [vmem:[#allocation5 + $0x30] sm:$0xff]  ;;  %v513_v39 = vld [vmem:[#allocation5 + $0x38] sm:$0xff]  ;;  %v514_v41 = vld [vmem:[#allocation5 + $0x40] sm:$0xff]  ;;  %v610_v6 = vadd.s32 (!%p719_p4), %v609_v4, %v608_v5 }
  0x58   : > { %841 = vmatpush3.bf16.msra.mxu1 %v840_v10  ;;  %862 = vmatpush3.bf16.msra.mxu0 %v861_v32  ;;  %v870_v40 = vpack.c.bf16 %v513_v39, %v512_v38  ;;  %v515_v42 = vld [vmem:[#allocation5 + $0x48] sm:$0xff]  ;;  %v516_v44 = vld [vmem:[#allocation5 + $0x50] sm:$0xff]  ;;  %v517_v45 = vld [vmem:[#allocation5 + $0x58] sm:$0xff] }
  0x59   : > { %842 = vmatprep.subr.bf16.mxu1 %v1067_v7  ;;  %863 = vmatprep.subr.bf16.mxu0 %v1067_v7  ;;  %v873_v43 = vpack.c.bf16 %v515_v42, %v514_v41  ;;  %v876_v46 = vpack.c.bf16 %v517_v45, %v516_v44  ;;  %v518_v47 = vld [vmem:[#allocation5 + $0x60] sm:$0xff]  ;;  %v519_v48 = vld [vmem:[#allocation5 + $0x68] sm:$0xff]  ;;  %v520_v55 = vld [vmem:[#allocation5 + $0x70] sm:$0xff]  ;;  %vm611_vm2 = vcmp.lt.s32.totalorder (!%p719_p4), %v610_v6, 50 }
  0x5a   : > { %v879_v49 = vpack.c.bf16 %v519_v48, %v518_v47  ;;  %v714_v50 = vld [vmem:[%s1284_s2] ss:$0 sm:$0xff]  ;;  %v521_v56 = vld [vmem:[#allocation5 + $0x78] sm:$0xff] }
  0x5b   : > { %v882_v57 = vpack.c.bf16 %v521_v56, %v520_v55  ;;  %v716_v58 = vld [vmem:[%s1286_s4] ss:$0 sm:$0xff] }
  0x5c   : > { %844 = vmatpush3.bf16.msra.mxu1 %v843_v13  ;;  %865 = vmatpush3.bf16.msra.mxu0 %v864_v34  ;;  %v717_v63 = vld [vmem:[%s1288_s6] ss:$0 sm:$0xff] }
  0x5d   : > { %845 = vmatprep.subr.bf16.mxu1 %v1067_v7  ;;  %866 = vmatprep.subr.bf16.mxu0 %v1067_v7 }
  0x60   : > { %847 = vmatpush3.bf16.msra.mxu1 %v846_v16  ;;  %868 = vmatpush3.bf16.msra.mxu0 %v867_v37 }
  0x61   : > { %848 = vmatprep.subr.bf16.mxu1 %v1067_v7  ;;  %869 = vmatprep.subr.bf16.mxu0 %v1067_v7 }
  0x64   : > { %850 = vmatpush3.bf16.msra.mxu1 %v849_v19  ;;  %871 = vmatpush3.bf16.msra.mxu0 %v870_v40 }
  0x65   : > { %851 = vmatprep.subr.bf16.mxu1 %v1067_v7  ;;  %872 = vmatprep.subr.bf16.mxu0 %v1067_v7 }
  0x68   : > { %853 = vmatpush3.bf16.msra.mxu1 %v852_v22  ;;  %874 = vmatpush3.bf16.msra.mxu0 %v873_v43 }
  0x69   : > { %854 = vmatprep.subr.bf16.mxu1 %v1067_v7  ;;  %875 = vmatprep.subr.bf16.mxu0 %v1067_v7 }
  0x6c   : > { %856 = vmatpush3.bf16.msra.mxu1 %v855_v25  ;;  %877 = vmatpush3.bf16.msra.mxu0 %v876_v46 }
  0x6d   : > { %857 = vmatprep.subr.bf16.mxu1 %v1067_v7  ;;  %878 = vmatprep.subr.bf16.mxu0 %v1067_v7 }
  0x70   : > { %859 = vmatpush3.bf16.msra.mxu1 %v858_v28  ;;  %880 = vmatpush3.bf16.msra.mxu0 %v879_v49 }
  0x71   : > { %881 = vmatprep.subr.bf16.mxu0 %v1067_v7  ;;  %v613_v7 = vld [vmem:[#allocation7] sm:$0xff] (!%p719_p4) }
  0x74   : > { %883 = vmatpush3.bf16.msra.mxu0 %v882_v57 }
 0x125   : > { %v407_v51 = vpop.f32.mrb[0].mxu0 }
 0x126   : > { %v408_v52 = vadd.f32 %v714_v50, %v407_v51  ;;  %v765_v53 = vpop.f32.mrb[1].mxu0 }
 0x128   : > { %v411_v54 = vmax.f32 %v408_v52, 0.0 }
 0x12a   : > { %799 = vmatmul.mubr.f32.vlgmr.msra.gmra.mrb[0].mxu1 %v411_v54 }
 0x1fd   : > { %v501_v59 = vpop.f32.mrb[0].mxu1 }
 0x1fe   : > { %v502_v60 = vadd.f32 %v716_v58, %v501_v59  ;;  %v800_v61 = vpop.f32.mrb[1].mxu1 }
 0x200   : > { %v505_v62 = vmax.f32 %v502_v60, 0.0 }
 0x202   : > { %834 = vmatmul.mubr.f32.vlgmr.msra.gmra.mrb[2].mxu0 %v505_v62 }
 0x2d0   : > { %606 = sbr.rel (%p719_p4) target bundleno = 732 (0x2dc), region = 64 }
 0x2d5   : > { %v595_v0 = vpop.f32.mrb[2].mxu0 }
 0x2d6   : > { %v596_v1 = vadd.f32 %v717_v63, %v595_v0  ;;  %v835_v2 = vpop.f32.mrb[3].mxu0 }
 0x2d8   : > { %v612_v8 = vsel %vm611_vm2, %v596_v1, -inf }
 0x2d9   : > { %v614_v9 = vmax.f32 %v613_v7, %v612_v8 }
 0x2db   : > { %615 = vst [vmem:[#allocation7] sm:$0xff] %v614_v9 }
 0x2dc PF: > { %p720_p9 = scmp.gt.s32.totalorder %s602_s16, 50 }
 0x2de   : > { %619 = sbr.rel (%p720_p9) target bundleno = 742 (0x2e6), region = 68 }
 0x2e2   : > { %v620_v10 = vld [vmem:[#allocation7] sm:$0xff] (!%p720_p9) }
 0x2e3   : > { %v621_v11 = vmax.f32 (!%p720_p9), %v620_v10, %v596_v1 }
 0x2e5   : > { %622 = vst [vmem:[#allocation7] sm:$0xff] %v621_v11 }
 0x2e6 PF: > { %p1247_p10 = scmp.eq.s32.totalorder %s704_s27, 6  ;;  %s1068_s9 = smov [#allocation7]  }
 0x2e7   : > { %s632_s19 = sshll.u32 %s1068_s9, 4  ;;  %s633_s19 = int_to_ptr.vmem [resolvable:$true] %s632_s19 }
 0x2e8   : > { %s998_s20 = scalar_lea.vmem %s633_s19, 128  ;;  %p1005_p0 = scmp.lt.s32.totalorder %s633_s19, %s633_s19 }
 0x2e9   : > { %p999_p11 = scmp.ne.s32.totalorder %s633_s19, %s998_s20  ;;  %p1006_p1 = scmp.lt.s32.totalorder %s998_s20, %s998_s20 }
 0x2eb   : > { %p1000_p12 = pnand %p999_p11, %p1247_p10  ;;  %p1007_p2 = por %p1006_p1, %p1005_p0 }
 0x2ed   : > { %p1001_p13 = pneg %p1000_p12 }
 0x2ef   : > { %p1008_p5 = pnand %p1007_p2, %p1001_p13 }
 0x2f1   : > { %1011 = shalt.err (!%p1008_p5)
}
 0x2f2   : > { %s1012_s27 = scalar_lea.hbm %s1289_s7, 128 }
 0x2f3   : > { %p1013_p7 = scmp.ne.s32.totalorder %s1289_s7, %s1012_s27  ;;  %p1018_p6 = scmp.lt.u32.totalorder %s1012_s27, %s1289_s7 }
 0x2f5   : > { %p1014_p3 = pnand %p1013_p7, %p1247_p10 }
 0x2f7   : > { %p1015_p8 = pneg %p1014_p3 }
 0x2f9   : > { %p1020_p4 = pnand %p1018_p6, %p1015_p8 }
 0x2fb   : > { %1023 = shalt.err (!%p1020_p4)
}
 0x2fc   : > { %893 = dma.vmem_to_hbm [thread:$0]  (%p1247_p10), %s633_s19, 128, %s1289_s7, [#allocation4]  }
 0x2fd   : > { %1045 = dma.done.wait (%p1247_p10), [#allocation4], 128  }
 0x2fe   : > { %1047 = vsyncadd (%p1247_p10), [#allocation4], 4294967168 }
 0x2ff PF: > { %s20_s26 = sadd.s32 1, %s1058_s26   ;;  %s1299_s24 = smov %s1054_s25 }
 0x300   : > { %p17_p9 = scmp.ge.s32.totalorder %s20_s26, 9   ;;  %s1300_s25 = smov %s1302_s28 }
 0x302   :  { %19 = sbr.rel (!%p17_p9) target bundleno = 4 (0x4), region = 97 }
 0x309   :  { %645 = vsyncpa [#allocation3], 1 }
 0x30a   :  { %647 = vsyncpa [#allocation3 + $0x1], 1 }
 0x30b   :  { %648 = vsyncpa [#allocation6], 1 }
 0x30c   :  { %649 = vsyncpa [#allocation4], 1 }
 0x30d   :  { %651 = vsyncpa [#allocation4 + $0x1], 1 }

</bundles_post_ra>
